<compile_context>
chip_gen: v6e
topology: v6e:2x2x1
jax: 0.10.0
libtpu: 0.0.40
codegen_flags: <defaults>
</compile_context>

<pallas_src>
import functools

import jax
import jax.numpy as jnp
from jax.experimental import pallas as pl
from jax.experimental.pallas import tpu as pltpu


def _basis_bias_force_kernel(x_ref, rep_ref, m_ref,
                             w1_ref, w1t_ref, b1_ref,
                             w2_ref, w2t_ref, b2_ref,
                             w3_ref, w3t4_ref, b3_ref,
                             sel_ref, f_ref, *, inv_var, compute_dtype):
    cd = compute_dtype

    # ---- in-kernel 1->R replication via a 0/1 matmul (exact in f32) ----
    x = x_ref[...]                                          # (Bn, n_in) f32
    xr = jnp.dot(x, rep_ref[...],
                 preferred_element_type=jnp.float32)        # (Bn, n_in*R)

    # ---- Gaussian basis over all (feature, center) pairs in one shot ----
    diff = xr - m_ref[...]                                  # (Bn, n_in*R)
    basis = jnp.exp(-0.5 * inv_var * diff * diff)
    # per-(feature,center) force-direction factor; the 1/var is folded into sel
    wd = basis * diff

    # ---- MLP forward (SiLU), one wide matmul per layer, f32 accumulate ----
    # SiLU' factors d_k are computed immediately while z_k / s_k are hot so
    # only d1/d2/d3 stay live into the backward pass.
    z1 = jnp.dot(basis.astype(cd), w1_ref[...],
                 preferred_element_type=jnp.float32) + b1_ref[...]
    s1 = jax.nn.sigmoid(z1)
    h1 = z1 * s1
    d1 = s1 * (1.0 + z1 * (1.0 - s1))

    z2 = jnp.dot(h1.astype(cd), w2_ref[...],
                 preferred_element_type=jnp.float32) + b2_ref[...]
    s2 = jax.nn.sigmoid(z2)
    h2 = z2 * s2
    d2 = s2 * (1.0 + z2 * (1.0 - s2))

    z3 = jnp.dot(h2.astype(cd), w3_ref[...],
                 preferred_element_type=jnp.float32) + b3_ref[...]
    s3 = jax.nn.sigmoid(z3)
    d3 = s3 * (1.0 + z3 * (1.0 - s3))
    # final bias value h3 @ w4^T only matters through its gradient (w4 is
    # pre-folded into w3t4 in the wrapper).

    # ---- analytic backward of sum_n bias_n w.r.t. x ----
    g_h2 = jnp.dot(d3.astype(cd), w3t4_ref[...],
                   preferred_element_type=jnp.float32)
    g_z2 = g_h2 * d2
    g_h1 = jnp.dot(g_z2.astype(cd), w2t_ref[...],
                   preferred_element_type=jnp.float32)
    g_z1 = g_h1 * d1
    g_b = jnp.dot(g_z1.astype(cd), w1t_ref[...],
                  preferred_element_type=jnp.float32)       # (Bn, n_in*R)

    # force = -d(sum b)/dx = sum_r g_b * basis * (x - mean)/var ; the segmented
    # sum over R centers runs on the MXU via the (1/var-scaled) block-diagonal
    # ones matrix, producing the lane-packed (Bn, n_in) result directly.
    seg = g_b * wd
    f_ref[...] = jnp.dot(seg.astype(cd), sel_ref[...],
                         preferred_element_type=jnp.float32)


def basis_bias_force(x, means, w1, b1, w2, b2, w3, b3, w4, *, var,
                     block_n=None, compute_dtype=jnp.bfloat16):
    """Force = -grad_x(sum_n bias(x)_n) for the BasisBias module.

    x: (N, n_in) f32, means: (1, R), w1: (n_in, R, neurons) stored (in, out),
    w2/w3: (neurons, neurons) stored (in, out), b*: (1, neurons),
    w4: (1, neurons)  (== Linear(neurons, 1, bias=False) weight).

    compute_dtype controls the MXU operand dtype only (accumulation and all
    elementwise math stay f32).  Default bfloat16 is fastest on every TPU
    generation; pass jnp.float32 for reference-tight numerics.
    """
    n, n_in = x.shape
    r = int(means.reshape(-1).shape[0])
    neurons = int(w1.shape[-1])
    nr = n_in * r
    cd = compute_dtype
    inv_var = 1.0 / float(var)

    # ----- wrapper-side layout + constant-folding (done once, outside kernel) -
    x32 = x.astype(jnp.float32)                                       # (N, n_in)
    means_rep = jnp.tile(means.reshape(1, r).astype(jnp.float32), (1, n_in))
    # replication matrix: rep[i, i*R + p] = 1  (kept f32 so xr is exact)
    rep = jnp.kron(jnp.eye(n_in, dtype=jnp.float32),
                   jnp.ones((1, r), jnp.float32))                     # (n_in, nr)
    w1f = w1.reshape(nr, neurons).astype(jnp.float32)
    w1c, w1t = w1f.astype(cd), w1f.T.astype(cd)
    w2f = w2.astype(jnp.float32)
    w2c, w2t = w2f.astype(cd), w2f.T.astype(cd)
    w3f = w3.astype(jnp.float32)
    w3c = w3f.astype(cd)
    # fold w4 into W3^T:  g_h2 = (d3 * w4) @ W3^T == d3 @ (w4^T * W3^T)
    w3t4 = (w4.reshape(-1, 1).astype(jnp.float32) * w3f.T).astype(cd)
    b1f = b1.reshape(1, neurons).astype(jnp.float32)
    b2f = b2.reshape(1, neurons).astype(jnp.float32)
    b3f = b3.reshape(1, neurons).astype(jnp.float32)
    # block-diagonal segment-sum matrix with 1/var folded in:
    # sel[i*R + p, j] = inv_var * (i == j)
    sel = (inv_var * jnp.kron(jnp.eye(n_in, dtype=jnp.float32),
                              jnp.ones((r, 1), jnp.float32))).astype(cd)

    # ----- batch tiling: big blocks (amortize per-step overhead); even block
    # count so v7x's 2 TensorCores get a balanced "parallel" split ------------
    if block_n is None:
        nb = max(1, pl.cdiv(n, 4096))
        if n > 8:
            nb = max(2, nb)
            nb += nb % 2                    # even number of blocks
        block_n = pl.cdiv(n, nb)
    block_n = max(8, min(int(block_n), ((n + 7) // 8) * 8))
    block_n = ((block_n + 7) // 8) * 8
    n_blocks = pl.cdiv(n, block_n)
    n_pad = n_blocks * block_n
    if n_pad != n:
        x32 = jnp.pad(x32, ((0, n_pad - n), (0, 0)))    # pad the small array only

    kernel = functools.partial(_basis_bias_force_kernel,
                               inv_var=inv_var, compute_dtype=cd)

    def const(shape):
        return pl.BlockSpec(shape, lambda i: (0, 0))

    # ~6 KiB/row covers the live f32 temporaries + double-buffered x/out tiles.
    vmem_bytes = int(min(64 * 1024 * 1024,
                         max(16 * 1024 * 1024, block_n * 6144 + 2 * 1024 * 1024)))

    out = pl.pallas_call(
        kernel,
        out_shape=jax.ShapeDtypeStruct((n_pad, n_in), jnp.float32),
        grid=(n_blocks,),
        in_specs=[
            pl.BlockSpec((block_n, n_in), lambda i: (i, 0)),  # raw x (tiled over N)
            const((n_in, nr)),                                # replication matrix
            const((1, nr)),                                   # means (repeated/feat)
            const((nr, neurons)),                             # W1 (flattened)
            const((neurons, nr)),                             # W1^T
            const((1, neurons)),                              # b1
            const((neurons, neurons)),                        # W2
            const((neurons, neurons)),                        # W2^T
            const((1, neurons)),                              # b2
            const((neurons, neurons)),                        # W3
            const((neurons, neurons)),                        # w4-scaled W3^T
            const((1, neurons)),                              # b3
            const((nr, n_in)),                                # 1/var * block-diag ones
        ],
        out_specs=pl.BlockSpec((block_n, n_in), lambda i: (i, 0)),
        compiler_params=pltpu.CompilerParams(
            dimension_semantics=("parallel",),
            vmem_limit_bytes=vmem_bytes),
    )(x32, rep, means_rep, w1c, w1t, b1f, w2c, w2t, b2f, w3c, w3t4, b3f, sel)

    return out[:n] if n_pad != n else out


# ------------------------- pure-JAX reference --------------------------------
def _ref_force(x, means, w1, b1, w2, b2, w3, b3, w4, *, var):
    n_in, r, neurons = w1.shape
    w1_flat = w1.reshape(n_in * r, neurons)

    def bias_sum(xx):
        diff = xx[:, :, None] - means.reshape(1, 1, -1)           # (N, n_in, R)
        basis = jnp.exp(-diff ** 2 / (2.0 * var)).reshape(xx.shape[0], -1)
        h = jax.nn.silu(basis @ w1_flat + b1)
        h = jax.nn.silu(h @ w2 + b2)
        h = jax.nn.silu(h @ w3 + b3)
        b = h @ w4.reshape(-1, 1)
        return jnp.sum(b)

    return -jax.grad(bias_sum)(x)


if __name__ == "__main__":
    # Module hyper-params (small, consistent with __init__ defaults)
    n_in = 4
    resolution = 10
    neurons = 50
    Lx, Hx, var = 0.0, 1.0, 1.0

    key = jax.random.PRNGKey(0)
    kx, kx2, k1, k2, k3, k4, kb1, kb2, kb3 = jax.random.split(key, 9)

    # means = linspace(Lx + (Hx-Lx)/res, Hx, res), shaped (1, R)
    msh_lx = Lx + (Hx - Lx) / resolution
    means = jnp.linspace(msh_lx, Hx, resolution, dtype=jnp.float32).reshape(1, -1)

    # Deterministic synthetic parameters (Linear weights stored as (in, out)).
    w1 = 0.2 * jax.random.normal(k1, (n_in, resolution, neurons), jnp.float32)
    b1 = 0.05 * jax.random.normal(kb1, (1, neurons), jnp.float32)
    w2 = 0.2 * jax.random.normal(k2, (neurons, neurons), jnp.float32)
    b2 = 0.05 * jax.random.normal(kb2, (1, neurons), jnp.float32)
    w3 = 0.2 * jax.random.normal(k3, (neurons, neurons), jnp.float32)
    b3 = 0.05 * jax.random.normal(kb3, (1, neurons), jnp.float32)
    w4 = 0.2 * jax.random.normal(k4, (1, neurons), jnp.float32)   # Linear(neurons,1,bias=False)

    # --- case 1: small batch, single block, f32 matmul operands (tight check) ---
    x_small = jax.random.uniform(kx, (8, n_in), jnp.float32, minval=Lx, maxval=Hx)
    f1 = basis_bias_force(x_small, means, w1, b1, w2, b2, w3, b3, w4,
                          var=var, compute_dtype=jnp.float32)
    f1 = jax.block_until_ready(f1)
    ref1 = _ref_force(x_small, means, w1, b1, w2, b2, w3, b3, w4, var=var)
    assert f1.shape == (8, n_in)
    assert jnp.allclose(f1, ref1, atol=2e-3, rtol=2e-3), (
        f"f32 small mismatch: max abs err {jnp.max(jnp.abs(f1 - ref1))}")

    # --- case 2: explicit multi-block grid + padding path, f32 (tight check) ---
    x_big = jax.random.uniform(kx2, (100, n_in), jnp.float32, minval=Lx, maxval=Hx)
    f2 = basis_bias_force(x_big, means, w1, b1, w2, b2, w3, b3, w4,
                          var=var, block_n=32, compute_dtype=jnp.float32)
    f2 = jax.block_until_ready(f2)
    ref2 = _ref_force(x_big, means, w1, b1, w2, b2, w3, b3, w4, var=var)
    assert f2.shape == (100, n_in)
    assert jnp.allclose(f2, ref2, atol=2e-3, rtol=2e-3), (
        f"f32 tiled mismatch: max abs err {jnp.max(jnp.abs(f2 - ref2))}")

    # --- case 3: default config (bf16 MXU operands, adaptive block_n) ---
    f3 = basis_bias_force(x_big, means, w1, b1, w2, b2, w3, b3, w4, var=var)
    f3 = jax.block_until_ready(f3)
    assert f3.shape == (100, n_in)
    assert jnp.allclose(f3, ref2, atol=5e-2, rtol=5e-2), (
        f"bf16 mismatch: max abs err {jnp.max(jnp.abs(f3 - ref2))}")

    print("KERNEL_OK")
</pallas_src>

<mosaic_0001>
module attributes {stable_mosaic.version = 11 : i64} {
  func.func @_basis_bias_force_kernel(%arg0: i32, %arg1: memref<8x4xf32, #tpu.memory_space<vmem>>, %arg2: memref<4x40xf32, #tpu.memory_space<vmem>>, %arg3: memref<1x40xf32, #tpu.memory_space<vmem>>, %arg4: memref<40x50xf32, #tpu.memory_space<vmem>>, %arg5: memref<50x40xf32, #tpu.memory_space<vmem>>, %arg6: memref<1x50xf32, #tpu.memory_space<vmem>>, %arg7: memref<50x50xf32, #tpu.memory_space<vmem>>, %arg8: memref<50x50xf32, #tpu.memory_space<vmem>>, %arg9: memref<1x50xf32, #tpu.memory_space<vmem>>, %arg10: memref<50x50xf32, #tpu.memory_space<vmem>>, %arg11: memref<50x50xf32, #tpu.memory_space<vmem>>, %arg12: memref<1x50xf32, #tpu.memory_space<vmem>>, %arg13: memref<40x4xf32, #tpu.memory_space<vmem>>, %arg14: memref<8x4xf32, #tpu.memory_space<vmem>>) attributes {dimension_semantics = [#tpu.dimension_semantics<parallel>], iteration_bounds = array<i64: 1>, scalar_prefetch = 0 : i64, scratch_operands = 0 : i64, tpu.core_type = #tpu.core_type<tc>, window_params = [{transform_indices = @transform_0, window_bounds = array<i64: 8, 4>}, {pipeline_mode = #tpu.pipeline_mode<synchronous>, transform_indices = @transform_1, window_bounds = array<i64: 4, 40>}, {pipeline_mode = #tpu.pipeline_mode<synchronous>, transform_indices = @transform_2, window_bounds = array<i64: 1, 40>}, {pipeline_mode = #tpu.pipeline_mode<synchronous>, transform_indices = @transform_3, window_bounds = array<i64: 40, 50>}, {pipeline_mode = #tpu.pipeline_mode<synchronous>, transform_indices = @transform_4, window_bounds = array<i64: 50, 40>}, {pipeline_mode = #tpu.pipeline_mode<synchronous>, transform_indices = @transform_5, window_bounds = array<i64: 1, 50>}, {pipeline_mode = #tpu.pipeline_mode<synchronous>, transform_indices = @transform_6, window_bounds = array<i64: 50, 50>}, {pipeline_mode = #tpu.pipeline_mode<synchronous>, transform_indices = @transform_7, window_bounds = array<i64: 50, 50>}, {pipeline_mode = #tpu.pipeline_mode<synchronous>, transform_indices = @transform_8, window_bounds = array<i64: 1, 50>}, {pipeline_mode = #tpu.pipeline_mode<synchronous>, transform_indices = @transform_9, window_bounds = array<i64: 50, 50>}, {pipeline_mode = #tpu.pipeline_mode<synchronous>, transform_indices = @transform_10, window_bounds = array<i64: 50, 50>}, {pipeline_mode = #tpu.pipeline_mode<synchronous>, transform_indices = @transform_11, window_bounds = array<i64: 1, 50>}, {pipeline_mode = #tpu.pipeline_mode<synchronous>, transform_indices = @transform_12, window_bounds = array<i64: 40, 4>}, {transform_indices = @transform_13, window_bounds = array<i64: 8, 4>}]} {
    %c0 = arith.constant 0 : index
    %c0_0 = arith.constant 0 : index
    %0 = vector.load %arg1[%c0, %c0_0] : memref<8x4xf32, #tpu.memory_space<vmem>>, vector<8x4xf32>
    %c0_1 = arith.constant 0 : index
    %c0_2 = arith.constant 0 : index
    %1 = vector.load %arg2[%c0_1, %c0_2] : memref<4x40xf32, #tpu.memory_space<vmem>>, vector<4x40xf32>
    %cst = arith.constant dense<0.000000e+00> : vector<8x40xf32>
    %2 = tpu.matmul %0, %1, %cst {dimension_numbers = #tpu.dot_dimension_numbers<[1], [0], [0], [1], [0, 0, 1, 1], [], []>} : vector<8x4xf32>, vector<4x40xf32>, vector<8x40xf32> -> vector<8x40xf32>
    %c0_3 = arith.constant 0 : index
    %c0_4 = arith.constant 0 : index
    %3 = vector.load %arg3[%c0_3, %c0_4] : memref<1x40xf32, #tpu.memory_space<vmem>>, vector<1x40xf32>
    %4 = vector.broadcast %3 : vector<1x40xf32> to vector<8x40xf32>
    %5 = arith.subf %2, %4 : vector<8x40xf32>
    %cst_5 = arith.constant -5.000000e-01 : f32
    %6 = vector.broadcast %cst_5 : f32 to vector<8x40xf32>
    %7 = arith.mulf %6, %5 : vector<8x40xf32>
    %8 = arith.mulf %7, %5 : vector<8x40xf32>
    %9 = math.exp %8 : vector<8x40xf32>
    %10 = arith.mulf %9, %5 : vector<8x40xf32>
    %c0_6 = arith.constant 0 : index
    %c0_7 = arith.constant 0 : index
    %11 = vector.load %arg4[%c0_6, %c0_7] : memref<40x50xf32, #tpu.memory_space<vmem>>, vector<40x50xf32>
    %cst_8 = arith.constant dense<0.000000e+00> : vector<8x50xf32>
    %12 = tpu.matmul %9, %11, %cst_8 {dimension_numbers = #tpu.dot_dimension_numbers<[1], [0], [0], [1], [0, 0, 1, 1], [], []>} : vector<8x40xf32>, vector<40x50xf32>, vector<8x50xf32> -> vector<8x50xf32>
    %c0_9 = arith.constant 0 : index
    %c0_10 = arith.constant 0 : index
    %13 = vector.load %arg6[%c0_9, %c0_10] : memref<1x50xf32, #tpu.memory_space<vmem>>, vector<1x50xf32>
    %14 = vector.broadcast %13 : vector<1x50xf32> to vector<8x50xf32>
    %15 = arith.addf %12, %14 : vector<8x50xf32>
    %16 = arith.negf %15 : vector<8x50xf32>
    %17 = math.exp %16 : vector<8x50xf32>
    %cst_11 = arith.constant 1.000000e+00 : f32
    %18 = vector.broadcast %cst_11 : f32 to vector<8x50xf32>
    %19 = arith.addf %18, %17 : vector<8x50xf32>
    %20 = arith.divf %18, %19 : vector<8x50xf32>
    %21 = arith.mulf %15, %20 : vector<8x50xf32>
    %cst_12 = arith.constant 1.000000e+00 : f32
    %22 = vector.broadcast %cst_12 : f32 to vector<8x50xf32>
    %23 = arith.subf %22, %20 : vector<8x50xf32>
    %24 = arith.mulf %15, %23 : vector<8x50xf32>
    %cst_13 = arith.constant 1.000000e+00 : f32
    %25 = vector.broadcast %cst_13 : f32 to vector<8x50xf32>
    %26 = arith.addf %25, %24 : vector<8x50xf32>
    %27 = arith.mulf %20, %26 : vector<8x50xf32>
    %c0_14 = arith.constant 0 : index
    %c0_15 = arith.constant 0 : index
    %28 = vector.load %arg7[%c0_14, %c0_15] : memref<50x50xf32, #tpu.memory_space<vmem>>, vector<50x50xf32>
    %cst_16 = arith.constant dense<0.000000e+00> : vector<8x50xf32>
    %29 = tpu.matmul %21, %28, %cst_16 {dimension_numbers = #tpu.dot_dimension_numbers<[1], [0], [0], [1], [0, 0, 1, 1], [], []>} : vector<8x50xf32>, vector<50x50xf32>, vector<8x50xf32> -> vector<8x50xf32>
    %c0_17 = arith.constant 0 : index
    %c0_18 = arith.constant 0 : index
    %30 = vector.load %arg9[%c0_17, %c0_18] : memref<1x50xf32, #tpu.memory_space<vmem>>, vector<1x50xf32>
    %31 = vector.broadcast %30 : vector<1x50xf32> to vector<8x50xf32>
    %32 = arith.addf %29, %31 : vector<8x50xf32>
    %33 = arith.negf %32 : vector<8x50xf32>
    %34 = math.exp %33 : vector<8x50xf32>
    %cst_19 = arith.constant 1.000000e+00 : f32
    %35 = vector.broadcast %cst_19 : f32 to vector<8x50xf32>
    %36 = arith.addf %35, %34 : vector<8x50xf32>
    %37 = arith.divf %35, %36 : vector<8x50xf32>
    %38 = arith.mulf %32, %37 : vector<8x50xf32>
    %cst_20 = arith.constant 1.000000e+00 : f32
    %39 = vector.broadcast %cst_20 : f32 to vector<8x50xf32>
    %40 = arith.subf %39, %37 : vector<8x50xf32>
    %41 = arith.mulf %32, %40 : vector<8x50xf32>
    %cst_21 = arith.constant 1.000000e+00 : f32
    %42 = vector.broadcast %cst_21 : f32 to vector<8x50xf32>
    %43 = arith.addf %42, %41 : vector<8x50xf32>
    %44 = arith.mulf %37, %43 : vector<8x50xf32>
    %c0_22 = arith.constant 0 : index
    %c0_23 = arith.constant 0 : index
    %45 = vector.load %arg10[%c0_22, %c0_23] : memref<50x50xf32, #tpu.memory_space<vmem>>, vector<50x50xf32>
    %cst_24 = arith.constant dense<0.000000e+00> : vector<8x50xf32>
    %46 = tpu.matmul %38, %45, %cst_24 {dimension_numbers = #tpu.dot_dimension_numbers<[1], [0], [0], [1], [0, 0, 1, 1], [], []>} : vector<8x50xf32>, vector<50x50xf32>, vector<8x50xf32> -> vector<8x50xf32>
    %c0_25 = arith.constant 0 : index
    %c0_26 = arith.constant 0 : index
    %47 = vector.load %arg12[%c0_25, %c0_26] : memref<1x50xf32, #tpu.memory_space<vmem>>, vector<1x50xf32>
    %48 = vector.broadcast %47 : vector<1x50xf32> to vector<8x50xf32>
    %49 = arith.addf %46, %48 : vector<8x50xf32>
    %50 = arith.negf %49 : vector<8x50xf32>
    %51 = math.exp %50 : vector<8x50xf32>
    %cst_27 = arith.constant 1.000000e+00 : f32
    %52 = vector.broadcast %cst_27 : f32 to vector<8x50xf32>
    %53 = arith.addf %52, %51 : vector<8x50xf32>
    %54 = arith.divf %52, %53 : vector<8x50xf32>
    %cst_28 = arith.constant 1.000000e+00 : f32
    %55 = vector.broadcast %cst_28 : f32 to vector<8x50xf32>
    %56 = arith.subf %55, %54 : vector<8x50xf32>
    %57 = arith.mulf %49, %56 : vector<8x50xf32>
    %cst_29 = arith.constant 1.000000e+00 : f32
    %58 = vector.broadcast %cst_29 : f32 to vector<8x50xf32>
    %59 = arith.addf %58, %57 : vector<8x50xf32>
    %60 = arith.mulf %54, %59 : vector<8x50xf32>
    %c0_30 = arith.constant 0 : index
    %c0_31 = arith.constant 0 : index
    %61 = vector.load %arg11[%c0_30, %c0_31] : memref<50x50xf32, #tpu.memory_space<vmem>>, vector<50x50xf32>
    %cst_32 = arith.constant dense<0.000000e+00> : vector<8x50xf32>
    %62 = tpu.matmul %60, %61, %cst_32 {dimension_numbers = #tpu.dot_dimension_numbers<[1], [0], [0], [1], [0, 0, 1, 1], [], []>} : vector<8x50xf32>, vector<50x50xf32>, vector<8x50xf32> -> vector<8x50xf32>
    %63 = arith.mulf %62, %44 : vector<8x50xf32>
    %c0_33 = arith.constant 0 : index
    %c0_34 = arith.constant 0 : index
    %64 = vector.load %arg8[%c0_33, %c0_34] : memref<50x50xf32, #tpu.memory_space<vmem>>, vector<50x50xf32>
    %cst_35 = arith.constant dense<0.000000e+00> : vector<8x50xf32>
    %65 = tpu.matmul %63, %64, %cst_35 {dimension_numbers = #tpu.dot_dimension_numbers<[1], [0], [0], [1], [0, 0, 1, 1], [], []>} : vector<8x50xf32>, vector<50x50xf32>, vector<8x50xf32> -> vector<8x50xf32>
    %66 = arith.mulf %65, %27 : vector<8x50xf32>
    %c0_36 = arith.constant 0 : index
    %c0_37 = arith.constant 0 : index
    %67 = vector.load %arg5[%c0_36, %c0_37] : memref<50x40xf32, #tpu.memory_space<vmem>>, vector<50x40xf32>
    %cst_38 = arith.constant dense<0.000000e+00> : vector<8x40xf32>
    %68 = tpu.matmul %66, %67, %cst_38 {dimension_numbers = #tpu.dot_dimension_numbers<[1], [0], [0], [1], [0, 0, 1, 1], [], []>} : vector<8x50xf32>, vector<50x40xf32>, vector<8x40xf32> -> vector<8x40xf32>
    %69 = arith.mulf %68, %10 : vector<8x40xf32>
    %c0_39 = arith.constant 0 : index
    %c0_40 = arith.constant 0 : index
    %70 = vector.load %arg13[%c0_39, %c0_40] : memref<40x4xf32, #tpu.memory_space<vmem>>, vector<40x4xf32>
    %cst_41 = arith.constant dense<0.000000e+00> : vector<8x4xf32>
    %71 = tpu.matmul %69, %70, %cst_41 {dimension_numbers = #tpu.dot_dimension_numbers<[1], [0], [0], [1], [0, 0, 1, 1], [], []>} : vector<8x40xf32>, vector<40x4xf32>, vector<8x4xf32> -> vector<8x4xf32>
    %c0_42 = arith.constant 0 : index
    %c0_43 = arith.constant 0 : index
    %72 = vector.load %arg14[%c0_42, %c0_43] : memref<8x4xf32, #tpu.memory_space<vmem>>, vector<8x4xf32>
    tpu.vector_store %arg14[%c0_42, %c0_43], %71 {strides = array<i32>} : memref<8x4xf32, #tpu.memory_space<vmem>>, vector<8x4xf32>,
    return
  }
  func.func @transform_0(%arg0: i32) -> (i32, i32) {
    %c0_i32 = arith.constant 0 : i32
    %c0_i32_0 = arith.constant 0 : i32
    return %arg0, %c0_i32 : i32, i32
  }
  func.func @transform_1(%arg0: i32) -> (i32, i32) {
    %c0_i32 = arith.constant 0 : i32
    %c0_i32_0 = arith.constant 0 : i32
    %c0_i32_1 = arith.constant 0 : i32
    return %c0_i32, %c0_i32_0 : i32, i32
  }
  func.func @transform_2(%arg0: i32) -> (i32, i32) {
    %c0_i32 = arith.constant 0 : i32
    %c0_i32_0 = arith.constant 0 : i32
    %c0_i32_1 = arith.constant 0 : i32
    return %c0_i32, %c0_i32_0 : i32, i32
  }
  func.func @transform_3(%arg0: i32) -> (i32, i32) {
    %c0_i32 = arith.constant 0 : i32
    %c0_i32_0 = arith.constant 0 : i32
    %c0_i32_1 = arith.constant 0 : i32
    return %c0_i32, %c0_i32_0 : i32, i32
  }
  func.func @transform_4(%arg0: i32) -> (i32, i32) {
    %c0_i32 = arith.constant 0 : i32
    %c0_i32_0 = arith.constant 0 : i32
    %c0_i32_1 = arith.constant 0 : i32
    return %c0_i32, %c0_i32_0 : i32, i32
  }
  func.func @transform_5(%arg0: i32) -> (i32, i32) {
    %c0_i32 = arith.constant 0 : i32
    %c0_i32_0 = arith.constant 0 : i32
    %c0_i32_1 = arith.constant 0 : i32
    return %c0_i32, %c0_i32_0 : i32, i32
  }
  func.func @transform_6(%arg0: i32) -> (i32, i32) {
    %c0_i32 = arith.constant 0 : i32
    %c0_i32_0 = arith.constant 0 : i32
    %c0_i32_1 = arith.constant 0 : i32
    return %c0_i32, %c0_i32_0 : i32, i32
  }
  func.func @transform_7(%arg0: i32) -> (i32, i32) {
    %c0_i32 = arith.constant 0 : i32
    %c0_i32_0 = arith.constant 0 : i32
    %c0_i32_1 = arith.constant 0 : i32
    return %c0_i32, %c0_i32_0 : i32, i32
  }
  func.func @transform_8(%arg0: i32) -> (i32, i32) {
    %c0_i32 = arith.constant 0 : i32
    %c0_i32_0 = arith.constant 0 : i32
    %c0_i32_1 = arith.constant 0 : i32
    return %c0_i32, %c0_i32_0 : i32, i32
  }
  func.func @transform_9(%arg0: i32) -> (i32, i32) {
    %c0_i32 = arith.constant 0 : i32
    %c0_i32_0 = arith.constant 0 : i32
    %c0_i32_1 = arith.constant 0 : i32
    return %c0_i32, %c0_i32_0 : i32, i32
  }
  func.func @transform_10(%arg0: i32) -> (i32, i32) {
    %c0_i32 = arith.constant 0 : i32
    %c0_i32_0 = arith.constant 0 : i32
    %c0_i32_1 = arith.constant 0 : i32
    return %c0_i32, %c0_i32_0 : i32, i32
  }
  func.func @transform_11(%arg0: i32) -> (i32, i32) {
    %c0_i32 = arith.constant 0 : i32
    %c0_i32_0 = arith.constant 0 : i32
    %c0_i32_1 = arith.constant 0 : i32
    return %c0_i32, %c0_i32_0 : i32, i32
  }
  func.func @transform_12(%arg0: i32) -> (i32, i32) {
    %c0_i32 = arith.constant 0 : i32
    %c0_i32_0 = arith.constant 0 : i32
    %c0_i32_1 = arith.constant 0 : i32
    return %c0_i32, %c0_i32_0 : i32, i32
  }
  func.func @transform_13(%arg0: i32) -> (i32, i32) {
    %c0_i32 = arith.constant 0 : i32
    %c0_i32_0 = arith.constant 0 : i32
    return %arg0, %c0_i32 : i32, i32
  }
}

</mosaic_0001>

<bundles_post_ra>
// kernel: tpu_custom_call.1
= control target key start
LH: loop header
LB: loop body
LE: loop exit
PB: predicated region body
PF: predicated region fallthrough
CT: control target
= control target key end

     0   :  { %18 = vsyncpa [#allocation3], 0  ;;  %s1517_s0 = inlined_call_operand.vmem [shape: f32[8,4], index: 0, kind: input, shape index: {}]   ;;  %s1518_s1 = inlined_call_operand.hbm [shape: f32[4,40], index: 1, kind: input, shape index: {}]   ;;  %s1519_s2 = inlined_call_operand.hbm [shape: f32[1,40], index: 2, kind: input, shape index: {}]   ;;  %s1520_s3 = inlined_call_operand.hbm [shape: f32[40,50], index: 3, kind: input, shape index: {}]   ;;  %s1521_s4 = inlined_call_operand.vmem [shape: f32[50,40], index: 4, kind: input, shape index: {}]   ;;  %s1522_s5 = inlined_call_operand.hbm [shape: f32[1,50], index: 5, kind: input, shape index: {}]   ;;  %s1523_s6 = inlined_call_operand.vmem [shape: f32[50,50], index: 6, kind: input, shape index: {}]   ;;  %s1524_s7 = inlined_call_operand.vmem [shape: f32[50,50], index: 7, kind: input, shape index: {}]   ;;  %s1525_s8 = inlined_call_operand.hbm [shape: f32[1,50], index: 8, kind: input, shape index: {}]   ;;  %s1526_s9 = inlined_call_operand.vmem [shape: f32[50,50], index: 9, kind: input, shape index: {}]   ;;  %s1527_s10 = inlined_call_operand.hbm [shape: f32[50,50], index: 10, kind: input, shape index: {}]   ;;  %s1528_s11 = inlined_call_operand.hbm [shape: f32[1,50], index: 11, kind: input, shape index: {}]   ;;  %s1529_s12 = inlined_call_operand.vmem [shape: f32[40,4], index: 12, kind: input, shape index: {}]   ;;  %s1530_s13 = inlined_call_operand.vmem [shape: f32[8,4], index: 13, kind: output, shape index: {}]  }
   0x1   :  { %19 = vsyncpa [#allocation5], 0 }
   0x2   :  { %20 = vsyncpa [#allocation8], 0 }
   0x3   :  { %21 = vsyncpa [#allocation11], 0  ;;  %s1225_s25 = smov [#allocation4]   ;;  %s1226_s27 = smov [#allocation7]  }
   0x4   :  { %s40_s26 = sshll.u32 %s1225_s25, 4  ;;  %s64_s28 = sshll.u32 %s1226_s27, 4  ;;  %s41_s26 = int_to_ptr.vmem [resolvable:$true] %s40_s26  ;;  %s65_s28 = int_to_ptr.vmem [resolvable:$true] %s64_s28 }
   0x5   :  { %s1085_s29 = scalar_lea.vmem %s41_s26, 16  ;;  %s1089_s30 = scalar_lea.vmem %s41_s26, 32 }
   0x6   :  { %p1086_p0 = scmp.ne.s32.totalorder %s41_s26, %s1085_s29  ;;  %p1090_p1 = scmp.lt.s32.totalorder %s41_s26, %s41_s26 }
   0x7   :  { %p1091_p2 = scmp.lt.s32.totalorder %s1089_s30, %s1085_s29 }
   0x9   :  { %p1092_p3 = por %p1091_p2, %p1090_p1 }
   0xb   :  { %p1093_p4 = pnand %p1092_p3, %p1086_p0 }
   0xd   :  { %1096 = shalt.err (!%p1093_p4)
}
   0xe   :  { %43 = dma.hbm_to_vmem [thread:$0]  %s1519_s2, 16, %s41_s26, [#allocation5]  }
   0xf   :  { %s1105_s16 = scalar_lea.vmem %s65_s28, 16  ;;  %s1109_s17 = scalar_lea.vmem %s65_s28, 32 }
  0x10   :  { %p1106_p5 = scmp.ne.s32.totalorder %s65_s28, %s1105_s16  ;;  %p1110_p6 = scmp.lt.s32.totalorder %s65_s28, %s65_s28 }
  0x11   :  { %p1111_p7 = scmp.lt.s32.totalorder %s1109_s17, %s1105_s16 }
  0x13   :  { %p1112_p8 = por %p1111_p7, %p1110_p6 }
  0x15   :  { %p1113_p9 = pnand %p1112_p8, %p1106_p5 }
  0x17   :  { %1116 = shalt.err (!%p1113_p9)
}
  0x18   :  { %67 = dma.hbm_to_vmem [thread:$0]  %s1522_s5, 16, %s65_s28, [#allocation8]  }
  0x19   :  { %s1227_s20 = smov [#allocation10]   ;;  %s1228_s22 = smov [#allocation2]  }
  0x1a   :  { %s89_s21 = sshll.u32 %s1227_s20, 4  ;;  %s30_s23 = sshll.u32 %s1228_s22, 4  ;;  %s90_s21 = int_to_ptr.vmem [resolvable:$true] %s89_s21  ;;  %s31_s23 = int_to_ptr.vmem [resolvable:$true] %s30_s23 }
  0x1b   :  { %s1125_s24 = scalar_lea.vmem %s90_s21, 896  ;;  %p1130_p11 = scmp.lt.s32.totalorder %s90_s21, %s90_s21 }
  0x1c   :  { %p1126_p10 = scmp.ne.s32.totalorder %s90_s21, %s1125_s24  ;;  %p1131_p12 = scmp.lt.s32.totalorder %s1125_s24, %s1125_s24 }
  0x1e   :  { %p1132_p13 = por %p1131_p12, %p1130_p11 }
  0x20   :  { %p1133_p0 = pnand %p1132_p13, %p1126_p10 }
  0x22   :  { %1136 = shalt.err (!%p1133_p0)
}
  0x23   :  { %s1229_s2 = smov 128   ;;  %s1230_s25 = smov 8  }
  0x24   :  { %95 = dma.hbm_to_vmem [thread:$0]  %s1527_s10, 896, %s90_s21, [#allocation11], %s1229_s2, %s1229_s2, %s1230_s25  }
  0x25   :  { %s1145_s5 = scalar_lea.vmem %s31_s23, 64  ;;  %p1150_p2 = scmp.lt.s32.totalorder %s31_s23, %s31_s23 }
  0x26   :  { %p1146_p1 = scmp.ne.s32.totalorder %s31_s23, %s1145_s5  ;;  %p1151_p3 = scmp.lt.s32.totalorder %s1145_s5, %s1145_s5 }
  0x28   :  { %p1152_p4 = por %p1151_p3, %p1150_p2 }
  0x2a   :  { %p1153_p5 = pnand %p1152_p4, %p1146_p1 }
  0x2c   :  { %1156 = shalt.err (!%p1153_p5)
}
  0x2d   :  { %33 = dma.hbm_to_vmem [thread:$0]  %s1518_s1, 64, %s31_s23, [#allocation3]  }
  0x2e   :  { %s1231_s30 = smov [#allocation6]   ;;  %s1232_s15 = smov [#allocation9]  }
  0x2f   :  { %s49_s14 = sshll.u32 %s1231_s30, 4  ;;  %s78_s16 = sshll.u32 %s1232_s15, 4  ;;  %s50_s14 = int_to_ptr.vmem [resolvable:$true] %s49_s14  ;;  %s79_s16 = int_to_ptr.vmem [resolvable:$true] %s78_s16 }
  0x30   :  { %s1165_s17 = scalar_lea.vmem %s50_s14, 640  ;;  %p1170_p7 = scmp.lt.s32.totalorder %s50_s14, %s50_s14 }
  0x31   :  { %p1166_p6 = scmp.ne.s32.totalorder %s50_s14, %s1165_s17  ;;  %p1171_p8 = scmp.lt.s32.totalorder %s1165_s17, %s1165_s17 }
  0x33   :  { %p1172_p9 = por %p1171_p8, %p1170_p7 }
  0x35   :  { %p1173_p10 = pnand %p1172_p9, %p1166_p6 }
  0x37   :  { %1176 = shalt.err (!%p1173_p10)
}
  0x38   :  { %55 = dma.hbm_to_vmem [thread:$0]  %s1520_s3, 640, %s50_s14, [#allocation5], %s1229_s2, %s1229_s2, %s1230_s25  }
  0x39   :  { %s1185_s19 = scalar_lea.vmem %s79_s16, 16  ;;  %s1189_s1 = scalar_lea.vmem %s79_s16, 32 }
  0x3a   :  { %p1186_p11 = scmp.ne.s32.totalorder %s79_s16, %s1185_s19  ;;  %p1190_p12 = scmp.lt.s32.totalorder %s79_s16, %s79_s16 }
  0x3b   :  { %p1191_p13 = scmp.lt.s32.totalorder %s1189_s1, %s1185_s19 }
  0x3d   :  { %p1192_p0 = por %p1191_p13, %p1190_p12 }
  0x3f   :  { %p1193_p1 = pnand %p1192_p0, %p1186_p11 }
  0x41   :  { %1196 = shalt.err (!%p1193_p1)
}
  0x42   :  { %81 = dma.hbm_to_vmem [thread:$0]  %s1525_s8, 16, %s79_s16, [#allocation8]  }
  0x43   :  { %s1233_s22 = smov [#allocation12]  }
  0x44   :  { %s102_s23 = sshll.u32 %s1233_s22, 4  ;;  %s103_s23 = int_to_ptr.vmem [resolvable:$true] %s102_s23 }
  0x45   :  { %s1205_s24 = scalar_lea.vmem %s103_s23, 16  ;;  %s1209_s26 = scalar_lea.vmem %s103_s23, 32 }
  0x46   :  { %p1206_p2 = scmp.ne.s32.totalorder %s103_s23, %s1205_s24  ;;  %p1210_p3 = scmp.lt.s32.totalorder %s103_s23, %s103_s23 }
  0x47   :  { %p1211_p4 = scmp.lt.s32.totalorder %s1209_s26, %s1205_s24 }
  0x49   :  { %p1212_p5 = por %p1211_p4, %p1210_p3 }
  0x4b   :  { %p1213_p6 = pnand %p1212_p5, %p1206_p2 }
  0x4d   :  { %1216 = shalt.err (!%p1213_p6)
}
  0x4e   :  { %105 = dma.hbm_to_vmem [thread:$0]  %s1528_s11, 16, %s103_s23, [#allocation11]  }
  0x4f   :  { %1217 = dma.done.wait [#allocation3], 64  }
  0x50   :  { %1218 = vsyncadd [#allocation3], 4294967232 }
  0x51   :  { %1219 = dma.done.wait [#allocation5], 656  }
  0x52   :  { %1220 = vsyncadd [#allocation5], 4294966640 }
  0x53   :  { %1221 = dma.done.wait [#allocation8], 32  }
  0x54   :  { %1222 = vsyncadd [#allocation8], 4294967264 }
  0x55   :  { %1223 = dma.done.wait [#allocation11], 912  }
  0x56   :  { %1224 = vsyncadd [#allocation11], 4294966384  ;;  %v1234_v0 = vmov 0.0   ;;  %vm1235_vm0 = vmmov 0   ;;  %vm135_vm1 = vcmask 1043456   ;;  %vm131_vm2 = vcmask 31744  }
  0x57   :  { %936 = vmatprep.subr.mxu0 %v1234_v0  ;;  %938 = vmatprep.mubr.msk.f32.mxu0 %vm1235_vm0, %v1234_v0  ;;  %v130_v1 = vld [vmem:[#allocation2] sm:$0xf]  ;;  %v129_v2 = vld [vmem:[%s1517_s0] sm:$0xff]  ;;  %v224_v5 = vld [vmem:[#allocation6 + $0x10] sm:$0xff]  ;;  %vm234_vm3 = vcmask 326656   ;;  %vm337_vm4 = vcmask 1041408  }
  0x58   :  { %941 = vmatprep.subr.mxu1 %v1234_v0  ;;  %951 = vmatprep.mubr.msk.f32.mxu1 %vm1235_vm0, %v1234_v0  ;;  %v226_v3 = vld [vmem:[#allocation6 + $0x20] sm:$0xff]  ;;  %v225_v4 = vld [vmem:[#allocation6 + $0x18] sm:$0xff]  ;;  %v223_v6 = vld [vmem:[#allocation6 + $0x8] sm:$0xff]  ;;  %vm333_vm5 = vcmask 408576  }
  0x59   :  { %937 = vmatpush3.msk.msra.mxu0 %vm135_vm1, %v130_v1  ;;  %942 = vmatpush3.msra.mxu1 %v226_v3  ;;  %v222_v7 = vld [vmem:[#allocation6] sm:$0xff]  ;;  %v863_v8 = vld [vmem:[#allocation4] ss:$0 sm:$0xff]  ;;  %v325_v17 = vld [vmem:[%s1523_s6 + $0x30] sm:$0x3] }
  0x5a   :  { %939 = vmatmul.mubr.msk.f32.vlgmr.msra.gmra.mxu0 %vm131_vm2, %v129_v2  ;;  %954 = vmatprep.subr.mxu0 %v1234_v0  ;;  %v324_v18 = vld [vmem:[%s1523_s6 + $0x28] sm:$0xff]  ;;  %v323_v19 = vld [vmem:[%s1523_s6 + $0x20] sm:$0xff]  ;;  %v322_v20 = vld [vmem:[%s1523_s6 + $0x18] sm:$0xff] }
  0x5b   :  { %968 = vmatprep.mubr.msk.f32.mxu0 %vm1235_vm0, %v1234_v0  ;;  %943 = vmatprep.subr.mxu1 %v1234_v0  ;;  %v321_v21 = vld [vmem:[%s1523_s6 + $0x10] sm:$0xff]  ;;  %v320_v22 = vld [vmem:[%s1523_s6 + $0x8] sm:$0xff]  ;;  %v319_v23 = vld [vmem:[%s1523_s6] sm:$0xff] }
  0x5c   :  { %944 = vmatpush3.msra.mxu1 %v225_v4  ;;  %955 = vmatpush3.msk.msra.mxu0 %vm337_vm4, %v325_v17  ;;  %v864_v24 = vld [vmem:[#allocation7] ss:$0 sm:$0xff]  ;;  %v428_v37 = vld [vmem:[%s1526_s9 + $0x30] sm:$0x3]  ;;  %v427_v38 = vld [vmem:[%s1526_s9 + $0x28] sm:$0xff] }
  0x5d   :  { %945 = vmatprep.subr.mxu1 %v1234_v0  ;;  %956 = vmatprep.subr.mxu0 %v1234_v0  ;;  %v426_v39 = vld [vmem:[%s1526_s9 + $0x20] sm:$0xff]  ;;  %v425_v40 = vld [vmem:[%s1526_s9 + $0x18] sm:$0xff]  ;;  %v424_v41 = vld [vmem:[%s1526_s9 + $0x10] sm:$0xff] }
  0x5e   :  { %946 = vmatpush3.msra.mxu1 %v224_v5  ;;  %957 = vmatpush3.msra.mxu0 %v324_v18  ;;  %v423_v42 = vld [vmem:[%s1526_s9 + $0x8] sm:$0xff]  ;;  %v422_v43 = vld [vmem:[%s1526_s9] sm:$0xff]  ;;  %v528_v57 = vld [vmem:[#allocation10 + $0x30] sm:$0x3] }
  0x5f   :  { %947 = vmatprep.subr.mxu1 %v1234_v0  ;;  %958 = vmatprep.subr.mxu0 %v1234_v0  ;;  %v867_v44 = vld [vmem:[#allocation9] ss:$0 sm:$0xff]  ;;  %v527_v58 = vld [vmem:[#allocation10 + $0x28] sm:$0xff]  ;;  %v526_v59 = vld [vmem:[#allocation10 + $0x20] sm:$0xff] }
  0x60   :  { %948 = vmatpush3.msra.mxu1 %v223_v6  ;;  %959 = vmatpush3.msra.mxu0 %v323_v19  ;;  %v525_v60 = vld [vmem:[#allocation10 + $0x18] sm:$0xff]  ;;  %v524_v61 = vld [vmem:[#allocation10 + $0x10] sm:$0xff]  ;;  %v523_v62 = vld [vmem:[#allocation10 + $0x8] sm:$0xff] }
  0x61   :  { %949 = vmatprep.subr.mxu1 %v1234_v0  ;;  %960 = vmatprep.subr.mxu0 %v1234_v0  ;;  %v522_v63 = vld [vmem:[#allocation10] sm:$0xff]  ;;  %v610_v3 = vld [vmem:[%s1524_s7 + $0x20] sm:$0xff]  ;;  %v609_v4 = vld [vmem:[%s1524_s7 + $0x18] sm:$0xff] }
  0x62   :  { %950 = vmatpush3.msra.mxu1 %v222_v7  ;;  %961 = vmatpush3.msra.mxu0 %v322_v20  ;;  %v612_v1 = vld [vmem:[%s1524_s7 + $0x30] sm:$0x3]  ;;  %v611_v2 = vld [vmem:[%s1524_s7 + $0x28] sm:$0xff]  ;;  %v871_v6 = vld [vmem:[#allocation12] ss:$0 sm:$0xff] }
  0x63   :  { %971 = vmatprep.subr.mxu1 %v1234_v0  ;;  %962 = vmatprep.subr.mxu0 %v1234_v0  ;;  %v608_v5 = vld [vmem:[%s1524_s7 + $0x10] sm:$0xff]  ;;  %v607_v19 = vld [vmem:[%s1524_s7 + $0x8] sm:$0xff]  ;;  %v606_v20 = vld [vmem:[%s1524_s7] sm:$0xff] }
  0x64   :  { %963 = vmatpush3.msra.mxu0 %v321_v21  ;;  %v696_v21 = vld [vmem:[%s1521_s4 + $0x30] sm:$0x3] }
  0x65   :  { %964 = vmatprep.subr.mxu0 %v1234_v0 }
  0x66   :  { %965 = vmatpush3.msra.mxu0 %v320_v22  ;;  %v695_v22 = vld [vmem:[%s1521_s4 + $0x28] sm:$0xff] }
  0x67   :  { %966 = vmatprep.subr.mxu0 %v1234_v0 }
  0x68   :  { %967 = vmatpush3.msra.mxu0 %v319_v23  ;;  %v694_v23 = vld [vmem:[%s1521_s4 + $0x20] sm:$0xff] }
  0x69   :  { %988 = vmatprep.subr.mxu0 %v1234_v0 }
 0x11a   :  { %v205_v9 = vpop.f32.mrf.mxu0 }
 0x11b   :  { %v216_v10 = vsub.f32 %v205_v9, %v863_v8 }
 0x11c   :  { %v940_v11 = vpop.f32.mrf.mxu0 }
 0x11d   :  { %v217_v12 = vmul.f32 -0.5, %v216_v10 }
 0x11f   :  { %v218_v13 = vmul.f32 %v217_v12, %v216_v10 }
 0x121   :  { %v219_v14 = vmul.f32 1.442695, %v218_v13 }
 0x123   :  { %1063 = vpow2.f32 %v219_v14 }
 0x130   :  { %v1064_v15 = vpop.eup %1063 }
 0x131   :  { %952 = vmatmul.mubr.msk.f32.vlgmr.msra.gmra.mxu1 %vm234_vm3, %v1064_v15  ;;  %v1346_v16 = vmul.f32 %v1064_v15, %v216_v10 }
 0x132   :  { %985 = vmatprep.mubr.msk.f32.mxu1 %vm1235_vm0, %v1234_v0  ;;  %972 = vmatpush3.msk.msra.mxu1 %vm337_vm4, %v428_v37 }
 0x133   :  { %973 = vmatprep.subr.mxu1 %v1234_v0 }
 0x134   :  { %974 = vmatpush3.msra.mxu1 %v427_v38  ;;  %v775_v38 = vld [vmem:[%s1529_s12 + $0x8] sm:$0xff] }
 0x135   :  { %975 = vmatprep.subr.mxu1 %v1234_v0 }
 0x136   :  { %976 = vmatpush3.msra.mxu1 %v426_v39  ;;  %v774_v39 = vld [vmem:[%s1529_s12] sm:$0xff] }
 0x137   :  { %977 = vmatprep.subr.mxu1 %v1234_v0 }
 0x138   :  { %978 = vmatpush3.msra.mxu1 %v425_v40 }
 0x139   :  { %979 = vmatprep.subr.mxu1 %v1234_v0 }
 0x13a   :  { %980 = vmatpush3.msra.mxu1 %v424_v41 }
 0x13b   :  { %981 = vmatprep.subr.mxu1 %v1234_v0 }
 0x13c   :  { %982 = vmatpush3.msra.mxu1 %v423_v42 }
 0x13d   :  { %983 = vmatprep.subr.mxu1 %v1234_v0 }
 0x13e   :  { %984 = vmatpush3.msra.mxu1 %v422_v43 }
 0x13f   :  { %1005 = vmatprep.subr.mxu1 %v1234_v0 }
 0x1f1   :  { %v304_v25 = vpop.f32.mrf.mxu1 }
 0x1f2   :  { %v305_v26 = vadd.f32 %v864_v24, %v304_v25  ;;  %v693_v24 = vld [vmem:[%s1521_s4 + $0x18] sm:$0xff]  ;;  %v692_v25 = vld [vmem:[%s1521_s4 + $0x10] sm:$0xff] }
 0x1f3   :  { %v953_v27 = vpop.f32.mrf.mxu1 }
 0x1f4   :  { %v866_v28 = vmul.f32 -1.442695, %v305_v26 }
 0x1f6   :  { %1065 = vpow2.f32 %v866_v28 }
 0x203   :  { %v1066_v29 = vpop.eup %1065 }
 0x204   :  { %v311_v30 = vadd.f32 1.0, %v1066_v29  ;;  %v691_v29 = vld [vmem:[%s1521_s4 + $0x8] sm:$0xff] }
 0x206   :  { %1067 = vrcp.f32 %v311_v30  ;;  %v690_v30 = vld [vmem:[%s1521_s4] sm:$0xff] }
 0x213   :  { %v1068_v31 = vpop.eup %1067 }
 0x214   :  { %v314_v32 = vmul.f32 %v1068_v31, %v305_v26  ;;  %v315_v33 = vsub.f32 1.0, %v1068_v31 }
 0x216   :  { %969 = vmatmul.mubr.msk.f32.vlgmr.msra.gmra.mxu0 %vm333_vm5, %v314_v32  ;;  %v316_v34 = vmul.f32 %v315_v33, %v305_v26  ;;  %v777_v32 = vld [vmem:[%s1529_s12 + $0x18] sm:$0xff]  ;;  %v776_v33 = vld [vmem:[%s1529_s12 + $0x10] sm:$0xff] }
 0x217   :  { %1002 = vmatprep.mubr.msk.f32.mxu0 %vm1235_vm0, %v1234_v0  ;;  %989 = vmatpush3.msk.msra.mxu0 %vm337_vm4, %v528_v57 }
 0x218   :  { %v317_v35 = vadd.f32 1.0, %v316_v34  ;;  %990 = vmatprep.subr.mxu0 %v1234_v0 }
 0x219   :  { %991 = vmatpush3.msra.mxu0 %v527_v58 }
 0x21a   :  { %v1382_v36 = vmul.f32 %v1068_v31, %v317_v35  ;;  %992 = vmatprep.subr.mxu0 %v1234_v0  ;;  %v778_v31 = vld [vmem:[%s1529_s12 + $0x20] sm:$0xff] }
 0x21b   :  { %993 = vmatpush3.msra.mxu0 %v526_v59 }
 0x21c   :  { %994 = vmatprep.subr.mxu0 %v1234_v0 }
 0x21d   :  { %995 = vmatpush3.msra.mxu0 %v525_v60 }
 0x21e   :  { %996 = vmatprep.subr.mxu0 %v1234_v0 }
 0x21f   :  { %997 = vmatpush3.msra.mxu0 %v524_v61 }
 0x220   :  { %998 = vmatprep.subr.mxu0 %v1234_v0 }
 0x221   :  { %999 = vmatpush3.msra.mxu0 %v523_v62 }
 0x222   :  { %1000 = vmatprep.subr.mxu0 %v1234_v0 }
 0x223   :  { %1001 = vmatpush3.msra.mxu0 %v522_v63 }
 0x224   :  { %1022 = vmatprep.subr.mxu0 %v1234_v0 }
 0x2d6   :  { %v407_v45 = vpop.f32.mrf.mxu0 }
 0x2d7   :  { %v408_v46 = vadd.f32 %v867_v44, %v407_v45 }
 0x2d8   :  { %v970_v47 = vpop.f32.mrf.mxu0 }
 0x2d9   :  { %v870_v48 = vmul.f32 -1.442695, %v408_v46 }
 0x2db   :  { %1069 = vpow2.f32 %v870_v48 }
 0x2e8   :  { %v1070_v49 = vpop.eup %1069 }
 0x2e9   :  { %v414_v50 = vadd.f32 1.0, %v1070_v49 }
 0x2eb   :  { %1071 = vrcp.f32 %v414_v50 }
 0x2f8   :  { %v1072_v51 = vpop.eup %1071 }
 0x2f9   :  { %v417_v52 = vmul.f32 %v1072_v51, %v408_v46  ;;  %v418_v53 = vsub.f32 1.0, %v1072_v51 }
 0x2fb   :  { %986 = vmatmul.mubr.msk.f32.vlgmr.msra.gmra.mxu1 %vm333_vm5, %v417_v52  ;;  %v419_v54 = vmul.f32 %v418_v53, %v408_v46 }
 0x2fc   :  { %1019 = vmatprep.mubr.msk.f32.mxu1 %vm1235_vm0, %v1234_v0  ;;  %1006 = vmatpush3.msk.msra.mxu1 %vm337_vm4, %v612_v1 }
 0x2fd   :  { %v420_v55 = vadd.f32 1.0, %v419_v54  ;;  %1007 = vmatprep.subr.mxu1 %v1234_v0 }
 0x2fe   :  { %1008 = vmatpush3.msra.mxu1 %v611_v2 }
 0x2ff   :  { %v1416_v56 = vmul.f32 %v1072_v51, %v420_v55  ;;  %1009 = vmatprep.subr.mxu1 %v1234_v0 }
 0x300   :  { %1010 = vmatpush3.msra.mxu1 %v610_v3 }
 0x301   :  { %1011 = vmatprep.subr.mxu1 %v1234_v0 }
 0x302   :  { %1012 = vmatpush3.msra.mxu1 %v609_v4 }
 0x303   :  { %1013 = vmatprep.subr.mxu1 %v1234_v0 }
 0x304   :  { %1014 = vmatpush3.msra.mxu1 %v608_v5 }
 0x305   :  { %1015 = vmatprep.subr.mxu1 %v1234_v0 }
 0x306   :  { %1016 = vmatpush3.msra.mxu1 %v607_v19 }
 0x307   :  { %1017 = vmatprep.subr.mxu1 %v1234_v0 }
 0x308   :  { %1018 = vmatpush3.msra.mxu1 %v606_v20 }
 0x309   :  { %1039 = vmatprep.subr.mxu1 %v1234_v0 }
 0x3bb   :  { %v508_v7 = vpop.f32.mrf.mxu1 }
 0x3bc   :  { %v509_v8 = vadd.f32 %v871_v6, %v508_v7 }
 0x3bd   :  { %v987_v9 = vpop.f32.mrf.mxu1 }
 0x3be   :  { %v874_v10 = vmul.f32 -1.442695, %v509_v8 }
 0x3c0   :  { %1073 = vpow2.f32 %v874_v10 }
 0x3cd   :  { %v1074_v11 = vpop.eup %1073 }
 0x3ce   :  { %v515_v12 = vadd.f32 1.0, %v1074_v11 }
 0x3d0   :  { %1075 = vrcp.f32 %v515_v12 }
 0x3dd   :  { %v1076_v13 = vpop.eup %1075 }
 0x3de   :  { %v518_v14 = vsub.f32 1.0, %v1076_v13 }
 0x3e0   :  { %v519_v15 = vmul.f32 %v518_v14, %v509_v8 }
 0x3e2   :  { %v520_v17 = vadd.f32 1.0, %v519_v15 }
 0x3e4   :  { %v521_v18 = vmul.f32 %v1076_v13, %v520_v17 }
 0x3e6   :  { %1003 = vmatmul.mubr.msk.f32.vlgmr.msra.gmra.mxu0 %vm333_vm5, %v521_v18 }
 0x3e7   :  { %1036 = vmatprep.mubr.msk.f32.mxu0 %vm1235_vm0, %v1234_v0  ;;  %1023 = vmatpush3.msk.msra.mxu0 %vm337_vm4, %v696_v21 }
 0x3e8   :  { %1024 = vmatprep.subr.mxu0 %v1234_v0 }
 0x3e9   :  { %1025 = vmatpush3.msra.mxu0 %v695_v22 }
 0x3ea   :  { %1026 = vmatprep.subr.mxu0 %v1234_v0 }
 0x3eb   :  { %1027 = vmatpush3.msra.mxu0 %v694_v23 }
 0x3ec   :  { %1028 = vmatprep.subr.mxu0 %v1234_v0 }
 0x3ed   :  { %1029 = vmatpush3.msra.mxu0 %v693_v24 }
 0x3ee   :  { %1030 = vmatprep.subr.mxu0 %v1234_v0 }
 0x3ef   :  { %1031 = vmatpush3.msra.mxu0 %v692_v25 }
 0x3f0   :  { %1032 = vmatprep.subr.mxu0 %v1234_v0 }
 0x3f1   :  { %1033 = vmatpush3.msra.mxu0 %v691_v29 }
 0x3f2   :  { %1034 = vmatprep.subr.mxu0 %v1234_v0 }
 0x3f3   :  { %1035 = vmatpush3.msra.mxu0 %v690_v30 }
 0x4a6   :  { %v601_v26 = vpop.f32.mrf.mxu0 }
 0x4a7   :  { %v605_v27 = vmul.f32 %v601_v26, %v1416_v56 }
 0x4a8   :  { %v1004_v28 = vpop.f32.mrf.mxu0 }
 0x4a9   :  { %1020 = vmatmul.mubr.msk.f32.vlgmr.msra.gmra.mxu1 %vm333_vm5, %v605_v27 }
 0x4aa   :  { %1049 = vmatprep.mubr.msk.f32.mxu1 %vm1235_vm0, %v1234_v0  ;;  %1040 = vmatpush3.msra.mxu1 %v778_v31 }
 0x4ab   :  { %1041 = vmatprep.subr.mxu1 %v1234_v0 }
 0x4ac   :  { %1042 = vmatpush3.msra.mxu1 %v777_v32 }
 0x4ad   :  { %1043 = vmatprep.subr.mxu1 %v1234_v0 }
 0x4ae   :  { %1044 = vmatpush3.msra.mxu1 %v776_v33 }
 0x4af   :  { %1045 = vmatprep.subr.mxu1 %v1234_v0 }
 0x4b0   :  { %1046 = vmatpush3.msra.mxu1 %v775_v38 }
 0x4b1   :  { %1047 = vmatprep.subr.mxu1 %v1234_v0 }
 0x4b2   :  { %1048 = vmatpush3.msra.mxu1 %v774_v39 }
 0x569   :  { %v685_v34 = vpop.f32.mrf.mxu1 }
 0x56a   :  { %v689_v35 = vmul.f32 %v685_v34, %v1382_v36 }
 0x56b   :  { %v1021_v37 = vpop.f32.mrf.mxu1 }
 0x56c   :  { %1037 = vmatmul.mubr.msk.f32.vlgmr.msra.gmra.mxu0 %vm333_vm5, %v689_v35 }
 0x62c   :  { %v769_v40 = vpop.f32.mrf.mxu0 }
 0x62d   :  { %v773_v41 = vmul.f32 %v769_v40, %v1346_v16 }
 0x62e   :  { %v1038_v42 = vpop.f32.mrf.mxu0 }
 0x62f   :  { %1050 = vmatmul.mubr.msk.f32.vlgmr.msra.gmra.mxu1 %vm234_vm3, %v773_v41 }
 0x6ef   :  { %v848_v36 = vpop.f32.mrf.mxu1 }
 0x6f0   :  { %852 = vst.msk [vmem:[%s1530_s13] sm:$0xff] %vm131_vm2, %v848_v36 }
 0x6f1   :  { %v1051_v43 = vpop.f32.mrf.mxu1 }
 0x6f2   :  { %857 = vsyncpa [#allocation3], 1 }
 0x6f3   :  { %858 = vsyncpa [#allocation5], 1 }
 0x6f4   :  { %859 = vsyncpa [#allocation8], 1 }
 0x6f5   :  { %860 = vsyncpa [#allocation11], 1 }

</bundles_post_ra>
